<compile_context>
chip_gen: v6e
topology: v6e:2x2x1
jax: 0.10.0
libtpu: 0.0.40
codegen_flags: <defaults>
</compile_context>

<pallas_src>
import functools

import jax
import jax.numpy as jnp
from jax.experimental import pallas as pl
from jax.experimental.pallas import tpu as pltpu

NEG_SLOPE = 0.2


def _round_up(x, m):
    return ((x + m - 1) // m) * m


def _leaky_relu(v):
    return jnp.where(v > 0, v, NEG_SLOPE * v)


def discriminator_kernel(x_ref,
                         w1_ref, b1_ref,
                         w2_ref, b2_ref,
                         w3_ref, b3_ref,
                         w4_ref, b4_ref,
                         out_ref,
                         acc_ref):
    k = pl.program_id(1)

    @pl.when(k == 0)
    def _():
        acc_ref[...] = jnp.zeros_like(acc_ref)

    # fc1 partial contraction: cast the f32 x tile to bf16 at compute time
    # (VPU cast is free under the DMA-bound pipeline), accumulate in f32.
    acc_ref[...] += jnp.dot(x_ref[...].astype(jnp.bfloat16), w1_ref[...],
                            preferred_element_type=jnp.float32)

    @pl.when(k == pl.num_programs(1) - 1)
    def _():
        # fc1 bias + LeakyReLU   (dropout = identity in eval mode)
        h = _leaky_relu(acc_ref[...] + b1_ref[...])

        # fc2 + LeakyReLU
        h = jnp.dot(h.astype(jnp.bfloat16), w2_ref[...],
                    preferred_element_type=jnp.float32)
        h = _leaky_relu(h + b2_ref[...])

        # fc3 + LeakyReLU
        h = jnp.dot(h.astype(jnp.bfloat16), w3_ref[...],
                    preferred_element_type=jnp.float32)
        h = _leaky_relu(h + b3_ref[...])

        # fc4 -> logits (stored unpadded; small masked store is DMA-hidden)
        logits = jnp.dot(h.astype(jnp.bfloat16), w4_ref[...],
                         preferred_element_type=jnp.float32)
        out_ref[...] = (logits + b4_ref[...]).astype(out_ref.dtype)


def _auto_tiles(B, d_in, tile_b):
    """Pick (tb, tk): ~4 MiB f32 x tile, tb multiple of 8, >=4 batch steps."""
    budget = 4 << 20  # target bytes for one f32 x tile buffer

    if tile_b is None:
        tb = budget // max(d_in * 4, 1)
        tb = max(8, min(1024, (tb // 8) * 8))
    else:
        tb = max(8, (int(tile_b) // 8) * 8)

    # Don't use a tile much larger than the (8-rounded) batch.
    tb = min(tb, _round_up(B, 8))
    # v7x has 2 TensorCores/chip: keep >= 4 grid steps along batch when B allows.
    if B >= 32:
        tb = min(tb, _round_up(pl.cdiv(B, 4), 8))
    tb = max(tb, 8)

    # Feature (K) tiling only when full rows would blow the tile budget.
    if tb * d_in * 4 <= budget:
        tk = d_in
    else:
        tk = d_in  # fallback: full rows (no clean 128-multiple divisor)
        max_tk = max(128, ((budget // (tb * 4)) // 128) * 128)
        for cand in range(max_tk, 127, -128):
            if d_in % cand == 0:
                tk = cand
                break
    return tb, tk


@functools.partial(jax.jit, static_argnames=("tile_b",))
def discriminator_forward(x, params, *, tile_b=None):
    """x: [B, C, H, W] (or any [B, ...]); returns logits [B, out_features]."""
    B = x.shape[0]
    x2d = x.reshape(B, -1)          # free reshape for contiguous x; stays f32
    d_in = x2d.shape[1]

    (w1, b1), (w2, b2), (w3, b3), (w4, b4) = params
    out_features = w4.shape[1]

    # bf16 weights (tiny vs. x traffic); f32 biases; f32 MXU accumulation.
    w1b = w1.astype(jnp.bfloat16)
    w2b = w2.astype(jnp.bfloat16)
    w3b = w3.astype(jnp.bfloat16)
    w4b = w4.astype(jnp.bfloat16)
    b1f = b1.astype(jnp.float32)
    b2f = b2.astype(jnp.float32)
    b3f = b3.astype(jnp.float32)
    b4f = b4.astype(jnp.float32)

    tb, tk = _auto_tiles(B, d_in, tile_b)
    grid = (pl.cdiv(B, tb), pl.cdiv(d_in, tk))

    def weight_spec(a):
        return pl.BlockSpec(a.shape, lambda i, k: (0,) * a.ndim)

    weight_bytes = ((w1b.size + w2b.size + w3b.size + w4b.size) * 2
                    + (b1f.size + b2f.size + b3f.size + b4f.size) * 4)
    flops = 2 * B * (d_in * 128 + 128 * 64 + 64 * 32 + 32 * out_features)
    bytes_accessed = B * d_in * 4 + weight_bytes + B * out_features * 4

    # VMEM budget: double-buffered x tile + output tile + acc scratch + weights.
    vmem_needed = (2 * tb * tk * 4
                   + 2 * tb * out_features * 4
                   + tb * 128 * 4
                   + 2 * weight_bytes)
    vmem_limit = int(min(max(vmem_needed + (8 << 20), 32 << 20), 48 << 20))

    out = pl.pallas_call(
        discriminator_kernel,
        out_shape=jax.ShapeDtypeStruct((B, out_features), jnp.float32),
        grid=grid,
        in_specs=[
            pl.BlockSpec((tb, tk), lambda i, k: (i, k)),
            pl.BlockSpec((tk, 128), lambda i, k: (k, 0)),
            weight_spec(b1f),
            weight_spec(w2b), weight_spec(b2f),
            weight_spec(w3b), weight_spec(b3f),
            weight_spec(w4b), weight_spec(b4f),
        ],
        out_specs=pl.BlockSpec((tb, out_features), lambda i, k: (i, 0)),
        scratch_shapes=[pltpu.VMEM((tb, 128), jnp.float32)],
        compiler_params=pltpu.CompilerParams(
            dimension_semantics=("parallel", "arbitrary"),
            vmem_limit_bytes=vmem_limit,
        ),
        cost_estimate=pl.CostEstimate(
            flops=flops, transcendentals=0, bytes_accessed=bytes_accessed),
    )(x2d, w1b, b1f, w2b, b2f, w3b, b3f, w4b, b4f)

    return out


def init_params(key, in_features, out_features):
    """Deterministic init mimicking nn.Linear (uniform +/- 1/sqrt(fan_in)).

    Weights stored as [in_dim, out_dim] so y = x @ W + b (== PyTorch x @ W.T + b).
    """
    dims = [(in_features, 128), (128, 64), (64, 32), (32, out_features)]
    params = []
    for (fan_in, fan_out) in dims:
        key, kw, kb = jax.random.split(key, 3)
        bound = 1.0 / jnp.sqrt(fan_in)
        w = jax.random.uniform(kw, (fan_in, fan_out), jnp.float32, -bound, bound)
        b = jax.random.uniform(kb, (1, fan_out), jnp.float32, -bound, bound)
        params.append((w, b))
    return params


def reference_forward(x, params):
    """Pure-JAX reference mirroring the kernel's bf16-operand / f32-accum math."""
    def bf(v):
        return v.astype(jnp.bfloat16).astype(jnp.float32)

    B = x.shape[0]
    (w1, b1), (w2, b2), (w3, b3), (w4, b4) = params
    hp = jax.lax.Precision.HIGHEST
    h = bf(x.reshape(B, -1))
    h = _leaky_relu(jnp.dot(h, bf(w1), precision=hp) + b1)
    h = _leaky_relu(jnp.dot(bf(h), bf(w2), precision=hp) + b2)
    h = _leaky_relu(jnp.dot(bf(h), bf(w3), precision=hp) + b3)
    return jnp.dot(bf(h), bf(w4), precision=hp) + b4


if __name__ == "__main__":
    key = jax.random.PRNGKey(0)
    k_x, k_p = jax.random.split(key)

    # Small example: x is NCHW [2, 4, 16, 16] -> in_features = 4*16*16 = 1024
    B, C, H, W = 2, 4, 16, 16
    in_features = C * H * W
    out_features = 1

    x = jax.random.normal(k_x, (B, C, H, W), jnp.float32)
    params = init_params(k_p, in_features, out_features)

    logits = discriminator_forward(x, params)
    jax.block_until_ready(logits)

    ref = reference_forward(x, params)
    assert logits.shape == (B, out_features), logits.shape
    assert jnp.allclose(logits, ref, atol=1e-2, rtol=1e-2), (
        f"mismatch: {logits} vs {ref}")

    print("KERNEL_OK")
</pallas_src>

<mosaic_0001>
module attributes {stable_mosaic.version = 11 : i64} {
  func.func @discriminator_kernel(%arg0: i32, %arg1: i32, %arg2: memref<8x1024xf32, #tpu.memory_space<vmem>>, %arg3: memref<1024x128xbf16, #tpu.memory_space<vmem>>, %arg4: memref<1x128xf32, #tpu.memory_space<vmem>>, %arg5: memref<128x64xbf16, #tpu.memory_space<vmem>>, %arg6: memref<1x64xf32, #tpu.memory_space<vmem>>, %arg7: memref<64x32xbf16, #tpu.memory_space<vmem>>, %arg8: memref<1x32xf32, #tpu.memory_space<vmem>>, %arg9: memref<32x1xbf16, #tpu.memory_space<vmem>>, %arg10: memref<1x1xf32, #tpu.memory_space<vmem>>, %arg11: memref<8x1xf32, #tpu.memory_space<vmem>>, %arg12: memref<8x128xf32, #tpu.memory_space<vmem>>) attributes {dimension_semantics = [#tpu.dimension_semantics<parallel>, #tpu.dimension_semantics<arbitrary>], iteration_bounds = array<i64: 1, 1>, scalar_prefetch = 0 : i64, scratch_operands = 1 : i64, tpu.core_type = #tpu.core_type<tc>, window_params = [{transform_indices = @transform_0, window_bounds = array<i64: 8, 1024>}, {transform_indices = @transform_1, window_bounds = array<i64: 1024, 128>}, {pipeline_mode = #tpu.pipeline_mode<synchronous>, transform_indices = @transform_2, window_bounds = array<i64: 1, 128>}, {pipeline_mode = #tpu.pipeline_mode<synchronous>, transform_indices = @transform_3, window_bounds = array<i64: 128, 64>}, {pipeline_mode = #tpu.pipeline_mode<synchronous>, transform_indices = @transform_4, window_bounds = array<i64: 1, 64>}, {pipeline_mode = #tpu.pipeline_mode<synchronous>, transform_indices = @transform_5, window_bounds = array<i64: 64, 32>}, {pipeline_mode = #tpu.pipeline_mode<synchronous>, transform_indices = @transform_6, window_bounds = array<i64: 1, 32>}, {pipeline_mode = #tpu.pipeline_mode<synchronous>, transform_indices = @transform_7, window_bounds = array<i64: 32, 1>}, {pipeline_mode = #tpu.pipeline_mode<synchronous>, transform_indices = @transform_8, window_bounds = array<i64: 1, 1>}, {transform_indices = @transform_9, window_bounds = array<i64: 8, 1>}]} {
    %c0_i32 = arith.constant 0 : i32
    %0 = arith.cmpi eq, %arg1, %c0_i32 : i32
    %1 = arith.extui %0 : i1 to i32
    %c0_i32_0 = arith.constant 0 : i32
    %2 = arith.cmpi ne, %1, %c0_i32_0 : i32
    scf.if %2 {
      %cst_10 = arith.constant 0.000000e+00 : f32
      %13 = vector.broadcast %cst_10 : f32 to vector<8x128xf32>
      %c0_11 = arith.constant 0 : index
      %c0_12 = arith.constant 0 : index
      %14 = vector.load %arg12[%c0_11, %c0_12] : memref<8x128xf32, #tpu.memory_space<vmem>>, vector<8x128xf32>
      tpu.vector_store %arg12[%c0_11, %c0_12], %13 {strides = array<i32>} : memref<8x128xf32, #tpu.memory_space<vmem>>, vector<8x128xf32>,
    } else {
    }
    %c0 = arith.constant 0 : index
    %c0_1 = arith.constant 0 : index
    %3 = vector.load %arg12[%c0, %c0_1] : memref<8x128xf32, #tpu.memory_space<vmem>>, vector<8x128xf32>
    %c0_2 = arith.constant 0 : index
    %c0_3 = arith.constant 0 : index
    %4 = vector.load %arg2[%c0_2, %c0_3] : memref<8x1024xf32, #tpu.memory_space<vmem>>, vector<8x1024xf32>
    %5 = arith.truncf %4 : vector<8x1024xf32> to vector<8x1024xbf16>
    %c0_4 = arith.constant 0 : index
    %c0_5 = arith.constant 0 : index
    %6 = vector.load %arg3[%c0_4, %c0_5] : memref<1024x128xbf16, #tpu.memory_space<vmem>>, vector<1024x128xbf16>
    %cst = arith.constant dense<0.000000e+00> : vector<8x128xf32>
    %7 = tpu.matmul %5, %6, %cst {dimension_numbers = #tpu.dot_dimension_numbers<[1], [0], [0], [1], [0, 0, 1, 1], [], []>} : vector<8x1024xbf16>, vector<1024x128xbf16>, vector<8x128xf32> -> vector<8x128xf32>
    %8 = arith.addf %3, %7 : vector<8x128xf32>
    %c0_6 = arith.constant 0 : index
    %c0_7 = arith.constant 0 : index
    %9 = vector.load %arg12[%c0_6, %c0_7] : memref<8x128xf32, #tpu.memory_space<vmem>>, vector<8x128xf32>
    tpu.vector_store %arg12[%c0_6, %c0_7], %8 {strides = array<i32>} : memref<8x128xf32, #tpu.memory_space<vmem>>, vector<8x128xf32>,
    %c0_i32_8 = arith.constant 0 : i32
    %10 = arith.cmpi eq, %arg1, %c0_i32_8 : i32
    %11 = arith.extui %10 : i1 to i32
    %c0_i32_9 = arith.constant 0 : i32
    %12 = arith.cmpi ne, %11, %c0_i32_9 : i32
    scf.if %12 {
      %c0_10 = arith.constant 0 : index
      %c0_11 = arith.constant 0 : index
      %13 = vector.load %arg12[%c0_10, %c0_11] : memref<8x128xf32, #tpu.memory_space<vmem>>, vector<8x128xf32>
      %c0_12 = arith.constant 0 : index
      %c0_13 = arith.constant 0 : index
      %14 = vector.load %arg4[%c0_12, %c0_13] : memref<1x128xf32, #tpu.memory_space<vmem>>, vector<1x128xf32>
      %15 = vector.broadcast %14 : vector<1x128xf32> to vector<8x128xf32>
      %16 = arith.addf %13, %15 : vector<8x128xf32>
      %cst_14 = arith.constant 0.000000e+00 : f32
      %17 = vector.broadcast %cst_14 : f32 to vector<8x128xf32>
      %18 = arith.cmpf ogt, %16, %17 : vector<8x128xf32>
      %cst_15 = arith.constant 2.000000e-01 : f32
      %19 = vector.broadcast %cst_15 : f32 to vector<8x128xf32>
      %20 = arith.mulf %19, %16 : vector<8x128xf32>
      %21 = arith.select %18, %16, %20 : vector<8x128xi1>, vector<8x128xf32>
      %22 = arith.truncf %21 : vector<8x128xf32> to vector<8x128xbf16>
      %c0_16 = arith.constant 0 : index
      %c0_17 = arith.constant 0 : index
      %23 = vector.load %arg5[%c0_16, %c0_17] : memref<128x64xbf16, #tpu.memory_space<vmem>>, vector<128x64xbf16>
      %cst_18 = arith.constant dense<0.000000e+00> : vector<8x64xf32>
      %24 = tpu.matmul %22, %23, %cst_18 {dimension_numbers = #tpu.dot_dimension_numbers<[1], [0], [0], [1], [0, 0, 1, 1], [], []>} : vector<8x128xbf16>, vector<128x64xbf16>, vector<8x64xf32> -> vector<8x64xf32>
      %c0_19 = arith.constant 0 : index
      %c0_20 = arith.constant 0 : index
      %25 = vector.load %arg6[%c0_19, %c0_20] : memref<1x64xf32, #tpu.memory_space<vmem>>, vector<1x64xf32>
      %26 = vector.broadcast %25 : vector<1x64xf32> to vector<8x64xf32>
      %27 = arith.addf %24, %26 : vector<8x64xf32>
      %cst_21 = arith.constant 0.000000e+00 : f32
      %28 = vector.broadcast %cst_21 : f32 to vector<8x64xf32>
      %29 = arith.cmpf ogt, %27, %28 : vector<8x64xf32>
      %cst_22 = arith.constant 2.000000e-01 : f32
      %30 = vector.broadcast %cst_22 : f32 to vector<8x64xf32>
      %31 = arith.mulf %30, %27 : vector<8x64xf32>
      %32 = arith.select %29, %27, %31 : vector<8x64xi1>, vector<8x64xf32>
      %33 = arith.truncf %32 : vector<8x64xf32> to vector<8x64xbf16>
      %c0_23 = arith.constant 0 : index
      %c0_24 = arith.constant 0 : index
      %34 = vector.load %arg7[%c0_23, %c0_24] : memref<64x32xbf16, #tpu.memory_space<vmem>>, vector<64x32xbf16>
      %cst_25 = arith.constant dense<0.000000e+00> : vector<8x32xf32>
      %35 = tpu.matmul %33, %34, %cst_25 {dimension_numbers = #tpu.dot_dimension_numbers<[1], [0], [0], [1], [0, 0, 1, 1], [], []>} : vector<8x64xbf16>, vector<64x32xbf16>, vector<8x32xf32> -> vector<8x32xf32>
      %c0_26 = arith.constant 0 : index
      %c0_27 = arith.constant 0 : index
      %36 = vector.load %arg8[%c0_26, %c0_27] : memref<1x32xf32, #tpu.memory_space<vmem>>, vector<1x32xf32>
      %37 = vector.broadcast %36 : vector<1x32xf32> to vector<8x32xf32>
      %38 = arith.addf %35, %37 : vector<8x32xf32>
      %cst_28 = arith.constant 0.000000e+00 : f32
      %39 = vector.broadcast %cst_28 : f32 to vector<8x32xf32>
      %40 = arith.cmpf ogt, %38, %39 : vector<8x32xf32>
      %cst_29 = arith.constant 2.000000e-01 : f32
      %41 = vector.broadcast %cst_29 : f32 to vector<8x32xf32>
      %42 = arith.mulf %41, %38 : vector<8x32xf32>
      %43 = arith.select %40, %38, %42 : vector<8x32xi1>, vector<8x32xf32>
      %44 = arith.truncf %43 : vector<8x32xf32> to vector<8x32xbf16>
      %c0_30 = arith.constant 0 : index
      %c0_31 = arith.constant 0 : index
      %45 = vector.load %arg9[%c0_30, %c0_31] : memref<32x1xbf16, #tpu.memory_space<vmem>>, vector<32x1xbf16>
      %cst_32 = arith.constant dense<0.000000e+00> : vector<8x1xf32>
      %46 = tpu.matmul %44, %45, %cst_32 {dimension_numbers = #tpu.dot_dimension_numbers<[1], [0], [0], [1], [0, 0, 1, 1], [], []>} : vector<8x32xbf16>, vector<32x1xbf16>, vector<8x1xf32> -> vector<8x1xf32>
      %c0_33 = arith.constant 0 : index
      %c0_34 = arith.constant 0 : index
      %47 = vector.load %arg10[%c0_33, %c0_34] : memref<1x1xf32, #tpu.memory_space<vmem>>, vector<1x1xf32>
      %48 = vector.broadcast %47 : vector<1x1xf32> to vector<8x1xf32>
      %49 = arith.addf %46, %48 : vector<8x1xf32>
      %c0_35 = arith.constant 0 : index
      %c0_36 = arith.constant 0 : index
      %50 = vector.load %arg11[%c0_35, %c0_36] : memref<8x1xf32, #tpu.memory_space<vmem>>, vector<8x1xf32>
      tpu.vector_store %arg11[%c0_35, %c0_36], %49 {strides = array<i32>} : memref<8x1xf32, #tpu.memory_space<vmem>>, vector<8x1xf32>,
    } else {
    }
    return
  }
  func.func @transform_0(%arg0: i32, %arg1: i32) -> (i32, i32) {
    %c0_i32 = arith.constant 0 : i32
    return %arg0, %arg1 : i32, i32
  }
  func.func @transform_1(%arg0: i32, %arg1: i32) -> (i32, i32) {
    %c0_i32 = arith.constant 0 : i32
    %c0_i32_0 = arith.constant 0 : i32
    return %arg1, %c0_i32 : i32, i32
  }
  func.func @transform_2(%arg0: i32, %arg1: i32) -> (i32, i32) {
    %c0_i32 = arith.constant 0 : i32
    %c0_i32_0 = arith.constant 0 : i32
    %c0_i32_1 = arith.constant 0 : i32
    return %c0_i32, %c0_i32_0 : i32, i32
  }
  func.func @transform_3(%arg0: i32, %arg1: i32) -> (i32, i32) {
    %c0_i32 = arith.constant 0 : i32
    %c0_i32_0 = arith.constant 0 : i32
    %c0_i32_1 = arith.constant 0 : i32
    return %c0_i32, %c0_i32_0 : i32, i32
  }
  func.func @transform_4(%arg0: i32, %arg1: i32) -> (i32, i32) {
    %c0_i32 = arith.constant 0 : i32
    %c0_i32_0 = arith.constant 0 : i32
    %c0_i32_1 = arith.constant 0 : i32
    return %c0_i32, %c0_i32_0 : i32, i32
  }
  func.func @transform_5(%arg0: i32, %arg1: i32) -> (i32, i32) {
    %c0_i32 = arith.constant 0 : i32
    %c0_i32_0 = arith.constant 0 : i32
    %c0_i32_1 = arith.constant 0 : i32
    return %c0_i32, %c0_i32_0 : i32, i32
  }
  func.func @transform_6(%arg0: i32, %arg1: i32) -> (i32, i32) {
    %c0_i32 = arith.constant 0 : i32
    %c0_i32_0 = arith.constant 0 : i32
    %c0_i32_1 = arith.constant 0 : i32
    return %c0_i32, %c0_i32_0 : i32, i32
  }
  func.func @transform_7(%arg0: i32, %arg1: i32) -> (i32, i32) {
    %c0_i32 = arith.constant 0 : i32
    %c0_i32_0 = arith.constant 0 : i32
    %c0_i32_1 = arith.constant 0 : i32
    return %c0_i32, %c0_i32_0 : i32, i32
  }
  func.func @transform_8(%arg0: i32, %arg1: i32) -> (i32, i32) {
    %c0_i32 = arith.constant 0 : i32
    %c0_i32_0 = arith.constant 0 : i32
    %c0_i32_1 = arith.constant 0 : i32
    return %c0_i32, %c0_i32_0 : i32, i32
  }
  func.func @transform_9(%arg0: i32, %arg1: i32) -> (i32, i32) {
    %c0_i32 = arith.constant 0 : i32
    %c0_i32_0 = arith.constant 0 : i32
    return %arg0, %c0_i32 : i32, i32
  }
}

</mosaic_0001>

<bundles_post_ra>
// kernel: discriminator_forward.1
= control target key start
LH: loop header
LB: loop body
LE: loop exit
PB: predicated region body
PF: predicated region fallthrough
CT: control target
= control target key end

     0   :  { %s1825_s0 = inlined_call_operand.vmem [shape: f32[2,1024], index: 0, kind: input, shape index: {}]   ;;  %s1826_s1 = inlined_call_operand.vmem [shape: bf16[1024,128], index: 1, kind: input, shape index: {}]   ;;  %s1827_s2 = inlined_call_operand.vmem [shape: f32[1,128], index: 2, kind: input, shape index: {}]   ;;  %s1828_s3 = inlined_call_operand.vmem [shape: bf16[128,64], index: 3, kind: input, shape index: {}]   ;;  %s1829_s4 = inlined_call_operand.vmem [shape: f32[1,64], index: 4, kind: input, shape index: {}]   ;;  %s1830_s5 = inlined_call_operand.vmem [shape: bf16[64,32], index: 5, kind: input, shape index: {}]   ;;  %s1831_s6 = inlined_call_operand.vmem [shape: f32[1,32], index: 6, kind: input, shape index: {}]   ;;  %s1832_s7 = inlined_call_operand.vmem [shape: bf16[32,1], index: 7, kind: input, shape index: {}]   ;;  %s1833_s8 = inlined_call_operand.<no memory space> [shape: f32[1,1], index: 8, kind: input, shape index: {}]   ;;  %s1834_s9 = inlined_call_operand.vmem [shape: f32[2,1], index: 9, kind: output, shape index: {}]  }
   0x1   :  { %v14_v0 = vstv %s1833_s8 }
   0x2   :  { %15 = vst [vmem:[#allocation3] sm:$0x1] %v14_v0 }
   0x3   :  { %v1379_v1 = vld [vmem:[%s1826_s1 + $0x78] sm:$0xff]   ;;  %v1383_v5 = vld [vmem:[%s1826_s1 + $0x70] sm:$0xff]   ;;  %v1387_v9 = vld [vmem:[%s1826_s1 + $0x68] sm:$0xff]   ;;  %v64_v31 = vlaneseq  ;;  %v1469_v36 = vmov 1983009808   ;;  %vm1471_vm0 = vmmov 0  }
   0x4   :  { %v1380_v2 = vld [vmem:[%s1826_s1 + $0xf8] sm:$0xff]   ;;  %1231 = vmatprep.subr.bf16.mxu0 %v1379_v1  ;;  %v1384_v6 = vld [vmem:[%s1826_s1 + $0xf0] sm:$0xff]   ;;  %v1388_v10 = vld [vmem:[%s1826_s1 + $0xe8] sm:$0xff]   ;;  %v62_v37 = vunpack.c.l.s4 %v1469_v36  ;;  %vm989_vm3 = vcmask 523264   ;;  %vm1060_vm5 = vcmask 261120   ;;  %vm1104_vm6 = vcmask 7168  }
   0x5   :  { %v1381_v3 = vld [vmem:[%s1826_s1 + $0x38] sm:$0xff]   ;;  %1253 = vmatprep.subr.bf16.mxu1 %v1380_v2  ;;  %v1385_v7 = vld [vmem:[%s1826_s1 + $0x30] sm:$0xff]   ;;  %v1389_v11 = vld [vmem:[%s1826_s1 + $0x28] sm:$0xff]   ;;  %v65_v38 = vshrl.u32 %v64_v31, 7 }
   0x6   :  { %v1382_v4 = vld [vmem:[%s1826_s1 + $0xb8] sm:$0xff]   ;;  %1232 = vmatpush3.bf16.msra.mxu0 %v1381_v3  ;;  %v1386_v8 = vld [vmem:[%s1826_s1 + $0xb0] sm:$0xff]   ;;  %v1390_v12 = vld [vmem:[%s1826_s1 + $0xa8] sm:$0xff]   ;;  %v63_v41 = vunpack.c.0.s8 %v62_v37 }
   0x7   :  { %1254 = vmatpush3.bf16.msra.mxu1 %v1382_v4  ;;  %1233 = vmatprep.subr.bf16.mxu0 %v1383_v5  ;;  %v1391_v13 = vld [vmem:[%s1826_s1 + $0x60] sm:$0xff]   ;;  %v1395_v17 = vld [vmem:[%s1826_s1 + $0x58] sm:$0xff]   ;;  %v1399_v21 = vld [vmem:[%s1826_s1 + $0x50] sm:$0xff]  }
   0x8   :  { %1255 = vmatprep.subr.bf16.mxu1 %v1384_v6  ;;  %v1392_v14 = vld [vmem:[%s1826_s1 + $0xe0] sm:$0xff]   ;;  %v1396_v18 = vld [vmem:[%s1826_s1 + $0xd8] sm:$0xff]   ;;  %v1400_v22 = vld [vmem:[%s1826_s1 + $0xd0] sm:$0xff]   ;;  %v1639_v44 = vsub.s32 %v63_v41, %v65_v38 }
   0x9   :  { %v1393_v15 = vld [vmem:[%s1826_s1 + $0x20] sm:$0xff]   ;;  %v1397_v19 = vld [vmem:[%s1826_s1 + $0x18] sm:$0xff]   ;;  %v1401_v23 = vld [vmem:[%s1826_s1 + $0x10] sm:$0xff]  }
   0xa   :  { %1234 = vmatpush3.bf16.msra.mxu0 %v1385_v7  ;;  %v1394_v16 = vld [vmem:[%s1826_s1 + $0xa0] sm:$0xff]   ;;  %v1398_v20 = vld [vmem:[%s1826_s1 + $0x98] sm:$0xff]   ;;  %v1402_v24 = vld [vmem:[%s1826_s1 + $0x90] sm:$0xff]  }
   0xb   :  { %1256 = vmatpush3.bf16.msra.mxu1 %v1386_v8  ;;  %1235 = vmatprep.subr.bf16.mxu0 %v1387_v9  ;;  %v1403_v25 = vld [vmem:[%s1826_s1 + $0x48] sm:$0xff]   ;;  %v1407_v29 = vld [vmem:[%s1826_s1 + $0x40] sm:$0xff]   ;;  %v1417_v42 = vld [vmem:[%s1826_s1 + $0x178] sm:$0xff]  }
   0xc   :  { %1257 = vmatprep.subr.bf16.mxu1 %v1388_v10  ;;  %v1404_v26 = vld [vmem:[%s1826_s1 + $0xc8] sm:$0xff]   ;;  %v1408_v30 = vld [vmem:[%s1826_s1 + $0xc0] sm:$0xff]   ;;  %v1418_v43 = vld [vmem:[%s1826_s1 + $0x1f8] sm:$0xff]  }
   0xd   :  { %v1405_v27 = vld [vmem:[%s1826_s1 + $0x8] sm:$0xff]   ;;  %v1409_v32 = vld [vmem:[%s1826_s1] sm:$0xff]   ;;  %v1419_v53 = vld [vmem:[%s1826_s1 + $0x138] sm:$0xff]  }
   0xe   :  { %1236 = vmatpush3.bf16.msra.mxu0 %v1389_v11  ;;  %v1406_v28 = vld [vmem:[%s1826_s1 + $0x88] sm:$0xff]   ;;  %v1410_v33 = vld [vmem:[%s1826_s1 + $0x80] sm:$0xff]   ;;  %v1420_v54 = vld [vmem:[%s1826_s1 + $0x1b8] sm:$0xff]  }
   0xf   :  { %1258 = vmatpush3.bf16.msra.mxu1 %v1390_v12  ;;  %1237 = vmatprep.subr.bf16.mxu0 %v1391_v13  ;;  %v1411_v34 = vld [vmem:[%s1825_s0] ss:$16 sps:$4 sm:$0xff]   ;;  %v1415_v39 = vld [vmem:[%s1825_s0 + $0x4] ss:$16 sps:$4 sm:$0xff]   ;;  %v1425_v63 = vld [vmem:[%s1826_s1 + $0x168] sm:$0xff]  }
  0x10   :  { %1259 = vmatprep.subr.bf16.mxu1 %v1392_v14  ;;  %v1413_v35 = vld [vmem:[%s1825_s0 + $0x20] ss:$16 sps:$4 sm:$0xff]   ;;  %v1416_v40 = vld [vmem:[%s1825_s0 + $0x24] ss:$16 sps:$4 sm:$0xff]   ;;  %v67_v45 = vrot.slane %v1411_v34, %v1639_v44  ;;  %v74_v47 = vrot.slane %v1415_v39, %v1639_v44  ;;  %v1426_v0 = vld [vmem:[%s1826_s1 + $0x1e8] sm:$0xff]  }
  0x11   :  { %v81_v46 = vrot.slane %v1413_v35, %v1639_v44  ;;  %v88_v48 = vrot.slane %v1416_v40, %v1639_v44  ;;  %v1421_v59 = vld [vmem:[%s1826_s1 + $0x170] sm:$0xff]   ;;  %v1427_v1 = vld [vmem:[%s1826_s1 + $0x128] sm:$0xff]   ;;  %v1429_v3 = vld [vmem:[%s1826_s1 + $0x160] sm:$0xff]   ;;  %v1470_v40 = vmov 0.0  }
  0x12   :  { %1238 = vmatpush3.bf16.msra.mxu0 %v1393_v15  ;;  %v1422_v60 = vld [vmem:[%s1826_s1 + $0x1f0] sm:$0xff]   ;;  %v1428_v2 = vld [vmem:[%s1826_s1 + $0x1a8] sm:$0xff]   ;;  %v1430_v4 = vld [vmem:[%s1826_s1 + $0x1e0] sm:$0xff]  }
  0x13   :  { %1260 = vmatpush3.bf16.msra.mxu1 %v1394_v16  ;;  %1239 = vmatprep.subr.bf16.mxu0 %v1395_v17  ;;  %v90_v49 = vcombine.high %v67_v45, %v81_v46  ;;  %v92_v50 = vcombine.high %v74_v47, %v88_v48  ;;  %v89_v51 = vcombine.low %v67_v45, %v81_v46  ;;  %v1423_v61 = vld [vmem:[%s1826_s1 + $0x130] sm:$0xff]   ;;  %v1431_v5 = vld [vmem:[%s1826_s1 + $0x120] sm:$0xff]   ;;  %v1433_v7 = vld [vmem:[%s1826_s1 + $0x158] sm:$0xff]  }
  0x14   :  { %1261 = vmatprep.subr.bf16.mxu1 %v1396_v18  ;;  %v91_v52 = vcombine.low %v74_v47, %v88_v48  ;;  %v1424_v62 = vld [vmem:[%s1826_s1 + $0x1b0] sm:$0xff]   ;;  %v1432_v6 = vld [vmem:[%s1826_s1 + $0x1a0] sm:$0xff]   ;;  %v1434_v8 = vld [vmem:[%s1826_s1 + $0x1d8] sm:$0xff]  }
  0x15   :  { %v138_v55 = vpack.c.bf16 %v90_v49, %v90_v49  ;;  %v140_v56 = vpack.c.bf16 %v92_v50, %v92_v50  ;;  %v137_v57 = vpack.c.bf16 %v89_v51, %v89_v51  ;;  %v1435_v9 = vld [vmem:[%s1826_s1 + $0x118] sm:$0xff]   ;;  %v1437_v11 = vld [vmem:[%s1826_s1 + $0x150] sm:$0xff]   ;;  %v1441_v15 = vld [vmem:[%s1826_s1 + $0x148] sm:$0xff]  }
  0x16   :  { %1240 = vmatpush3.bf16.msra.mxu0 %v1397_v19  ;;  %v139_v58 = vpack.c.bf16 %v91_v52, %v91_v52  ;;  %v1436_v10 = vld [vmem:[%s1826_s1 + $0x198] sm:$0xff]   ;;  %v1438_v12 = vld [vmem:[%s1826_s1 + $0x1d0] sm:$0xff]   ;;  %v1442_v16 = vld [vmem:[%s1826_s1 + $0x1c8] sm:$0xff]  }
  0x17   :  { %1262 = vmatpush3.bf16.msra.mxu1 %v1398_v20  ;;  %1241 = vmatprep.subr.bf16.mxu0 %v1399_v21  ;;  %v1439_v13 = vld [vmem:[%s1826_s1 + $0x110] sm:$0xff]   ;;  %v1443_v17 = vld [vmem:[%s1826_s1 + $0x108] sm:$0xff]   ;;  %v1445_v19 = vld [vmem:[%s1826_s1 + $0x140] sm:$0xff]  }
  0x18   :  { %1263 = vmatprep.subr.bf16.mxu1 %v1400_v22  ;;  %689 = vmatprep.mubr.bf16.mxu0 %v138_v55  ;;  %v1440_v14 = vld [vmem:[%s1826_s1 + $0x190] sm:$0xff]   ;;  %v1444_v18 = vld [vmem:[%s1826_s1 + $0x188] sm:$0xff]   ;;  %v1446_v20 = vld [vmem:[%s1826_s1 + $0x1c0] sm:$0xff]  }
  0x19   :  { %729 = vmatprep.mubr.bf16.mxu1 %v140_v56  ;;  %v1449_v21 = vld [vmem:[%s1825_s0 + $0x8] ss:$16 sps:$4 sm:$0xff]   ;;  %v1456_v41 = vld [vmem:[%s1828_s3 + $0x30] sm:$0xff]   ;;  %v1462_v47 = vld [vmem:[%s1828_s3] sm:$0xff]  }
  0x1a   :  { %1242 = vmatpush3.bf16.msra.mxu0 %v1401_v23  ;;  %v1451_v22 = vld [vmem:[%s1825_s0 + $0x28] ss:$16 sps:$4 sm:$0xff]   ;;  %v1453_v23 = vld [vmem:[%s1825_s0 + $0xc] ss:$16 sps:$4 sm:$0xff]   ;;  %v1460_v45 = vld [vmem:[%s1828_s3 + $0x10] sm:$0xff]  }
  0x1b   :  { %1264 = vmatpush3.bf16.msra.mxu1 %v1402_v24  ;;  %1243 = vmatprep.subr.bf16.mxu0 %v1403_v25  ;;  %v1447_v24 = vld [vmem:[%s1826_s1 + $0x100] sm:$0xff]   ;;  %v1455_v39 = vld [vmem:[%s1828_s3 + $0x38] sm:$0xff]   ;;  %v1461_v46 = vld [vmem:[%s1828_s3 + $0x8] sm:$0xff]  }
  0x1c   :  { %1265 = vmatprep.subr.bf16.mxu1 %v1404_v26  ;;  %v1448_v25 = vld [vmem:[%s1826_s1 + $0x180] sm:$0xff]   ;;  %v1454_v26 = vld [vmem:[%s1825_s0 + $0x2c] ss:$16 sps:$4 sm:$0xff]   ;;  %v1464_v49 = vld [vmem:[%s1830_s5 + $0x10] sm:$0xff]  }
  0x1d   :  { %v1463_v48 = vld [vmem:[%s1830_s5 + $0x18] sm:$0xff]  }
  0x1e   :  { %1244 = vmatpush3.bf16.msra.mxu0 %v1405_v27  ;;  %v103_v27 = vrot.slane %v1449_v21, %v1639_v44 }
  0x1f   :  { %1266 = vmatpush3.bf16.msra.mxu1 %v1406_v28  ;;  %1245 = vmatprep.subr.bf16.mxu0 %v1407_v29  ;;  %v117_v28 = vrot.slane %v1451_v22, %v1639_v44  ;;  %v110_v29 = vrot.slane %v1453_v23, %v1639_v44 }
  0x20   :  { %1267 = vmatprep.subr.bf16.mxu1 %v1408_v30  ;;  %v124_v30 = vrot.slane %v1454_v26, %v1639_v44  ;;  %v1459_v44 = vld [vmem:[%s1828_s3 + $0x18] sm:$0xff]   ;;  %v1468_v26 = vld [vmem:[%s1832_s7] sm:$0xff]  }
  0x21   :  { %v126_v31 = vcombine.high %v103_v27, %v117_v28 }
  0x22   :  { %1246 = vmatpush3.bf16.msra.mxu0 %v1409_v32  ;;  %v125_v32 = vcombine.low %v103_v27, %v117_v28  ;;  %v127_v34 = vcombine.low %v110_v29, %v124_v30  ;;  %v1221_v27 = vld [vmem:[%s1831_s6] ss:$0 sm:$0xff] }
  0x23   :  { %1268 = vmatpush3.bf16.msra.mxu1 %v1410_v33  ;;  %1275 = vmatprep.subr.bf16.mxu0 %v1417_v42  ;;  %v128_v33 = vcombine.high %v110_v29, %v124_v30  ;;  %v142_v35 = vpack.c.bf16 %v126_v31, %v126_v31  ;;  %v1457_v42 = vld [vmem:[%s1828_s3 + $0x28] sm:$0xff]  }
  0x24   :  { %1297 = vmatprep.subr.bf16.mxu1 %v1418_v43  ;;  %v141_v36 = vpack.c.bf16 %v125_v32, %v125_v32  ;;  %v143_v38 = vpack.c.bf16 %v127_v34, %v127_v34  ;;  %v1458_v43 = vld [vmem:[%s1828_s3 + $0x20] sm:$0xff]  }
  0x25   :  { %690 = vmatmul.mubr.bf16.vlgmr.msra.gmra.mxu0 %v137_v57  ;;  %v144_v37 = vpack.c.bf16 %v128_v33, %v128_v33 }
  0x26   :  { %730 = vmatmul.mubr.bf16.vlgmr.msra.gmra.mxu1 %v139_v58  ;;  %1276 = vmatpush3.bf16.msra.mxu0 %v1419_v53 }
  0x27   :  { %1298 = vmatpush3.bf16.msra.mxu1 %v1420_v54  ;;  %1277 = vmatprep.subr.bf16.mxu0 %v1421_v59 }
  0x28   :  { %1299 = vmatprep.subr.bf16.mxu1 %v1422_v60  ;;  %769 = vmatprep.mubr.bf16.mxu0 %v142_v35 }
  0x29   :  { %809 = vmatprep.mubr.bf16.mxu1 %v144_v37 }
  0x2a   :  { %1278 = vmatpush3.bf16.msra.mxu0 %v1423_v61 }
  0x2b   :  { %1300 = vmatpush3.bf16.msra.mxu1 %v1424_v62  ;;  %1279 = vmatprep.subr.bf16.mxu0 %v1425_v63 }
  0x2c   :  { %1301 = vmatprep.subr.bf16.mxu1 %v1426_v0 }
  0x2e   :  { %1280 = vmatpush3.bf16.msra.mxu0 %v1427_v1 }
  0x2f   :  { %1302 = vmatpush3.bf16.msra.mxu1 %v1428_v2  ;;  %1281 = vmatprep.subr.bf16.mxu0 %v1429_v3 }
  0x30   :  { %1303 = vmatprep.subr.bf16.mxu1 %v1430_v4 }
  0x32   :  { %1282 = vmatpush3.bf16.msra.mxu0 %v1431_v5 }
  0x33   :  { %1304 = vmatpush3.bf16.msra.mxu1 %v1432_v6  ;;  %1283 = vmatprep.subr.bf16.mxu0 %v1433_v7  ;;  %v1211_v6 = vld [vmem:[%s1827_s2] ss:$0 sm:$0xff] }
  0x34   :  { %1305 = vmatprep.subr.bf16.mxu1 %v1434_v8 }
  0x36   :  { %1284 = vmatpush3.bf16.msra.mxu0 %v1435_v9 }
  0x37   :  { %1306 = vmatpush3.bf16.msra.mxu1 %v1436_v10  ;;  %1285 = vmatprep.subr.bf16.mxu0 %v1437_v11 }
  0x38   :  { %1307 = vmatprep.subr.bf16.mxu1 %v1438_v12 }
  0x3a   :  { %1286 = vmatpush3.bf16.msra.mxu0 %v1439_v13 }
  0x3b   :  { %1308 = vmatpush3.bf16.msra.mxu1 %v1440_v14  ;;  %1287 = vmatprep.subr.bf16.mxu0 %v1441_v15  ;;  %v1465_v14 = vld [vmem:[%s1830_s5 + $0x8] sm:$0xff]   ;;  %v1466_v15 = vld [vmem:[%s1830_s5] sm:$0xff]  }
  0x3c   :  { %1309 = vmatprep.subr.bf16.mxu1 %v1442_v16  ;;  %v1212_v16 = vld [vmem:[%s1829_s4] ss:$0 sm:$0xff] }
  0x3e   :  { %1288 = vmatpush3.bf16.msra.mxu0 %v1443_v17 }
  0x3f   :  { %1310 = vmatpush3.bf16.msra.mxu1 %v1444_v18  ;;  %1289 = vmatprep.subr.bf16.mxu0 %v1445_v19 }
  0x40   :  { %1311 = vmatprep.subr.bf16.mxu1 %v1446_v20 }
  0x42   :  { %1290 = vmatpush3.bf16.msra.mxu0 %v1447_v24 }
  0x43   :  { %1312 = vmatpush3.bf16.msra.mxu1 %v1448_v25  ;;  %1336 = vmatprep.subr.bf16.mxu0 %v1470_v40  ;;  %v1467_v25 = vld [vmem:[%s1832_s7 + $0x8] sm:$0xff]  }
  0x44   :  { %1356 = vmatprep.subr.bf16.mxu1 %v1470_v40 }
  0x45   :  { %770 = vmatmul.mubr.bf16.vlgmr.msra.gmra.mxu0 %v141_v36  ;;  %v1227_v36 = vld [vmem:[#allocation3] ss:$0 sm:$0xff] }
  0x46   :  { %810 = vmatmul.mubr.bf16.vlgmr.msra.gmra.mxu1 %v143_v38  ;;  %1337 = vmatpush3.bf16.msra.mxu0 %v1455_v39 }
  0x47   :  { %1338 = vmatprep.subr.bf16.mxu0 %v1470_v40  ;;  %1352 = vmatprep.mubr.msk.bf16.mxu0 %vm1471_vm0, %v1470_v40 }
  0x48   :  { %1364 = vmatprep.mubr.msk.bf16.mxu1 %vm1471_vm0, %v1470_v40  ;;  %1357 = vmatpush3.bf16.msra.mxu1 %v1463_v48 }
  0x49   :  { %1358 = vmatprep.subr.bf16.mxu1 %v1470_v40 }
  0x4a   :  { %1339 = vmatpush3.bf16.msra.mxu0 %v1456_v41 }
  0x4b   :  { %1340 = vmatprep.subr.bf16.mxu0 %v1470_v40 }
  0x4c   :  { %1359 = vmatpush3.bf16.msra.mxu1 %v1464_v49 }
  0x4d   :  { %1360 = vmatprep.subr.bf16.mxu1 %v1470_v40 }
  0x4e   :  { %1341 = vmatpush3.bf16.msra.mxu0 %v1457_v42 }
  0x4f   :  { %1342 = vmatprep.subr.bf16.mxu0 %v1470_v40 }
  0x50   :  { %1361 = vmatpush3.bf16.msra.mxu1 %v1465_v14 }
  0x51   :  { %1362 = vmatprep.subr.bf16.mxu1 %v1470_v40 }
  0x52   :  { %1343 = vmatpush3.bf16.msra.mxu0 %v1458_v43 }
  0x53   :  { %1344 = vmatprep.subr.bf16.mxu0 %v1470_v40 }
  0x54   :  { %1363 = vmatpush3.bf16.msra.mxu1 %v1466_v15 }
  0x55   :  { %1368 = vmatprep.subr.bf16.mxu1 %v1470_v40 }
  0x56   :  { %1345 = vmatpush3.bf16.msra.mxu0 %v1459_v44 }
  0x57   :  { %1346 = vmatprep.subr.bf16.mxu0 %v1470_v40 }
  0x5a   :  { %1347 = vmatpush3.bf16.msra.mxu0 %v1460_v45 }
  0x5b   :  { %1348 = vmatprep.subr.bf16.mxu0 %v1470_v40 }
  0x5e   :  { %1349 = vmatpush3.bf16.msra.mxu0 %v1461_v46 }
  0x5f   :  { %1350 = vmatprep.subr.bf16.mxu0 %v1470_v40 }
  0x62   :  { %1351 = vmatpush3.bf16.msra.mxu0 %v1462_v47 }
  0xe5   :  { %v1247_v50 = vpop.f32.mrf.mxu0 }
  0xe6   :  { %v1269_v51 = vpop.f32.mrf.mxu1 }
  0xe7   :  { %v1248_v52 = vpop.f32.mrf.mxu0 }
  0xe8   :  { %v1270_v53 = vpop.f32.mrf.mxu1  ;;  %v1249_v58 = vadd.f32 %v1248_v52, %v1247_v50 }
  0xe9   :  { %v1250_v54 = vpop.f32.mrf.mxu0  ;;  %v1271_v59 = vadd.f32 %v1270_v53, %v1269_v51 }
  0xea   :  { %v1272_v55 = vpop.f32.mrf.mxu1 }
  0xeb   :  { %v1251_v56 = vpop.f32.mrf.mxu0  ;;  %v732_v0 = vadd.f32 %v1271_v59, %v1249_v58 }
  0xec   :  { %v1273_v57 = vpop.f32.mrf.mxu1 }
 0x105   :  { %v1291_v60 = vpop.f32.mrf.mxu0 }
 0x106   :  { %v1313_v61 = vpop.f32.mrf.mxu1 }
 0x107   :  { %v1292_v62 = vpop.f32.mrf.mxu0 }
 0x108   :  { %v1314_v63 = vpop.f32.mrf.mxu1  ;;  %v1293_v1 = vadd.f32 %v1292_v62, %v1291_v60 }
 0x109   :  { %v1294_v2 = vpop.f32.mrf.mxu0  ;;  %v1315_v5 = vadd.f32 %v1314_v63, %v1313_v61 }
 0x10a   :  { %v1316_v3 = vpop.f32.mrf.mxu1  ;;  %v772_v4 = vadd.f32 %v1293_v1, %v732_v0 }
 0x10b   :  { %v1295_v7 = vpop.f32.mrf.mxu0 }
 0x10c   :  { %v1317_v8 = vpop.f32.mrf.mxu1  ;;  %v812_v9 = vadd.f32 %v1315_v5, %v772_v4 }
 0x10e   :  { %v830_v10 = vadd.f32 %v1211_v6, %v812_v9 }
 0x110   :  { %vm831_vm1 = vcmp.gt.f32.partialorder %v830_v10, 0.0  ;;  %v832_v11 = vmul.f32 0.2, %v830_v10 }
 0x112   :  { %v833_v12 = vsel %vm831_vm1, %v830_v10, %v832_v11 }
 0x113   :  { %v834_v13 = vpack.c.bf16 %v833_v12, %v833_v12 }
 0x115   :  { %1353 = vmatmul.mubr.bf16.vlgmr.msra.gmra.mxu0 %v834_v13 }
 0x1d5   :  { %v940_v17 = vpop.f32.mrf.mxu0 }
 0x1d6   :  { %v941_v18 = vadd.f32 %v1212_v16, %v940_v17 }
 0x1d7   :  { %v1354_v19 = vpop.f32.mrf.mxu0 }
 0x1d8   :  { %vm946_vm2 = vcmp.gt.f32.partialorder %v941_v18, 0.0  ;;  %v947_v20 = vmul.f32 0.2, %v941_v18 }
 0x1d9   :  { %v943_v21 = vpop.f32.mrf.mxu0 }
 0x1da   :  { %v948_v22 = vsel %vm946_vm2, %v941_v18, %v947_v20 }
 0x1db   :  { %v949_v23 = vpack.c.bf16 %v948_v22, %v948_v22  ;;  %v1355_v24 = vpop.f32.mrf.mxu0 }
 0x1dd   :  { %1365 = vmatmul.mubr.msk.bf16.vlgmr.msra.gmra.mxu1 %vm989_vm3, %v949_v23 }
 0x1de   :  { %1372 = vmatprep.mubr.msk.bf16.mxu1 %vm1471_vm0, %v1470_v40  ;;  %1369 = vmatpush3.bf16.msra.mxu1 %v1467_v25 }
 0x1df   :  { %1370 = vmatprep.subr.bf16.mxu1 %v1470_v40 }
 0x1e2   :  { %1371 = vmatpush3.bf16.msra.mxu1 %v1468_v26 }
 0x29d   :  { %v1027_v28 = vpop.f32.mrf.mxu1 }
 0x29e   :  { %v1028_v29 = vadd.f32 %v1221_v27, %v1027_v28 }
 0x29f   :  { %v1366_v30 = vpop.f32.mrf.mxu1 }
 0x2a0   :  { %vm1033_vm4 = vcmp.gt.f32.partialorder %v1028_v29, 0.0  ;;  %v1034_v31 = vmul.f32 0.2, %v1028_v29 }
 0x2a1   :  { %v1030_v32 = vpop.f32.mrf.mxu1 }
 0x2a2   :  { %v1035_v33 = vsel %vm1033_vm4, %v1028_v29, %v1034_v31 }
 0x2a3   :  { %v1036_v34 = vpack.c.bf16 %v1035_v33, %v1035_v33  ;;  %v1367_v35 = vpop.f32.mrf.mxu1 }
 0x2a5   :  { %1373 = vmatmul.mubr.msk.bf16.vlgmr.msra.gmra.mxu1 %vm1060_vm5, %v1036_v34 }
 0x365   :  { %v1098_v37 = vpop.f32.mrf.mxu1 }
 0x366   :  { %v1099_v38 = vadd.f32 %v1227_v36, %v1098_v37 }
 0x367   :  { %v1374_v39 = vpop.f32.mrf.mxu1 }
 0x368   :  { %1105 = vst.msk [vmem:[#allocation4] sm:$0xff] %vm1104_vm6, %v1099_v38 }
 0x369   :  { %v1101_v40 = vpop.f32.mrf.mxu1 }
 0x36b   :  { %v1375_v41 = vpop.f32.mrf.mxu1 }
 0x36f   :  { %v1124_v42 = vld [vmem:[#allocation4] sm:$0x3] }
 0x370   :  { %1125 = vst [vmem:[%s1834_s9] sm:$0x3] %v1124_v42 }

</bundles_post_ra>
